<compile_context>
chip_gen: v5e
topology: v5e:2x2
jax: 0.10.0
libtpu: 0.0.40
codegen_flags: <defaults>
</compile_context>

<pallas_src>
import jax
import jax.numpy as jnp
from jax.experimental import pallas as pl
from jax.experimental.pallas import tpu as pltpu


def _build_embedding(num_steps: int, half_dim: int) -> jnp.ndarray:
    """Mirror of DiffusionEmbedding._build_embedding (float32)."""
    steps = jnp.arange(num_steps, dtype=jnp.float32)[:, None]          # (T, 1)
    freqs = 10.0 ** (jnp.arange(half_dim, dtype=jnp.float32)
                     / (half_dim - 1) * 4.0)[None, :]                  # (1, D/2)
    table = steps * freqs                                              # (T, D/2)
    return jnp.concatenate([jnp.sin(table), jnp.cos(table)], axis=1)   # (T, D)


def _diffusion_embedding_kernel(step_ref,             # SMEM (B,) int32  (scalar prefetch)
                                emb_ref,              # VMEM (T, E) f32
                                w1_ref, b1_ref,       # VMEM (E, P) bf16, (1, P) f32
                                w2_ref, b2_ref,       # VMEM (P, P) bf16, (1, P) f32
                                o_ref):               # VMEM (B, P) f32
    B = o_ref.shape[0]

    # Fused row gather of the sinusoidal table. B is small & static -> unrolled.
    rows = [emb_ref[pl.ds(step_ref[i], 1), :] for i in range(B)]
    x = jnp.concatenate(rows, axis=0)                                  # (B, E) f32

    # projection1 + SiLU : bf16 MXU inputs, f32 accumulate.
    h = jnp.dot(x.astype(jnp.bfloat16), w1_ref[...],
                preferred_element_type=jnp.float32) + b1_ref[...]
    h = h * jax.nn.sigmoid(h)                                          # SiLU (EUP)

    # projection2 + SiLU
    y = jnp.dot(h.astype(jnp.bfloat16), w2_ref[...],
                preferred_element_type=jnp.float32) + b2_ref[...]
    y = y * jax.nn.sigmoid(y)                                          # SiLU

    o_ref[...] = y.astype(o_ref.dtype)


def diffusion_embedding_forward(diffusion_step, embedding, w1, b1, w2, b2):
    """diffusion_step: (B,) int32 indices. Returns (B, P) float32."""
    B = diffusion_step.shape[0]
    P = w1.shape[1]
    vmem = pl.BlockSpec(memory_space=pltpu.VMEM)
    return pl.pallas_call(
        _diffusion_embedding_kernel,
        out_shape=jax.ShapeDtypeStruct((B, P), jnp.float32),
        grid_spec=pltpu.PrefetchScalarGridSpec(
            num_scalar_prefetch=1,      # diffusion_step lands in SMEM
            grid=(1,),                  # single invocation; whole arrays in VMEM
            in_specs=[vmem, vmem, vmem, vmem, vmem],
            out_specs=vmem,
        ),
    )(diffusion_step, embedding, w1, b1, w2, b2)


class DiffusionEmbeddingJAX:
    """Parameter container + forward, matching the PyTorch module."""

    def __init__(self, num_steps, embedding_dim=128, projection_dim=None, key=None):
        if projection_dim is None:
            projection_dim = embedding_dim
        if key is None:
            key = jax.random.PRNGKey(0)
        self.embedding = _build_embedding(num_steps, embedding_dim // 2)  # (T, E) f32

        k1, k2, k3, k4 = jax.random.split(key, 4)
        lim1 = 1.0 / (embedding_dim ** 0.5)
        lim2 = 1.0 / (projection_dim ** 0.5)
        # Stored as (in, out) so the kernel does x @ W.  Weights in bf16 (half
        # the DMA bytes, native MXU input dtype); biases kept f32.
        self.w1 = jax.random.uniform(k1, (embedding_dim, projection_dim),
                                     jnp.float32, -lim1, lim1).astype(jnp.bfloat16)
        self.b1 = jax.random.uniform(k2, (1, projection_dim), jnp.float32, -lim1, lim1)
        self.w2 = jax.random.uniform(k3, (projection_dim, projection_dim),
                                     jnp.float32, -lim2, lim2).astype(jnp.bfloat16)
        self.b2 = jax.random.uniform(k4, (1, projection_dim), jnp.float32, -lim2, lim2)

    def __call__(self, diffusion_step):
        steps = jnp.asarray(diffusion_step, dtype=jnp.int32)
        return diffusion_embedding_forward(
            steps, self.embedding, self.w1, self.b1, self.w2, self.b2)


def _reference_forward_matched(module, diffusion_step):
    """Same math as the kernel (bf16 weights, f32 accumulate) in plain JAX."""
    x = jnp.take(module.embedding, diffusion_step, axis=0)
    h = jnp.dot(x.astype(jnp.bfloat16), module.w1,
                preferred_element_type=jnp.float32) + module.b1
    h = h * jax.nn.sigmoid(h)
    y = jnp.dot(h.astype(jnp.bfloat16), module.w2,
                preferred_element_type=jnp.float32) + module.b2
    return y * jax.nn.sigmoid(y)


def _reference_forward_f32(module, diffusion_step):
    """Full-f32 PyTorch-semantics reference (loose check vs bf16 weights)."""
    x = jnp.take(module.embedding, diffusion_step, axis=0)
    h = x @ module.w1.astype(jnp.float32) + module.b1
    h = h * jax.nn.sigmoid(h)
    y = h @ module.w2.astype(jnp.float32) + module.b2
    return y * jax.nn.sigmoid(y)


if __name__ == "__main__":
    num_steps = 50
    embedding_dim = 128       # module default (projection_dim = embedding_dim)
    batch = 8                 # batch of diffusion-step indices

    key = jax.random.PRNGKey(0)
    k_param, k_step = jax.random.split(key)

    module = DiffusionEmbeddingJAX(num_steps, embedding_dim, key=k_param)
    diffusion_step = jax.random.randint(k_step, (batch,), 0, num_steps, dtype=jnp.int32)

    out = module(diffusion_step)
    out = jax.block_until_ready(out)
    assert out.shape == (batch, embedding_dim), out.shape

    # Tight check vs a reference using the exact same (bf16-weight) math.
    ref_matched = _reference_forward_matched(module, diffusion_step)
    assert jnp.allclose(out, ref_matched, atol=1e-3, rtol=1e-3), \
        "mismatch vs bf16-matched reference"

    # Loose check vs full-f32 PyTorch semantics (bf16 weight rounding only).
    ref_f32 = _reference_forward_f32(module, diffusion_step)
    assert jnp.allclose(out, ref_f32, atol=5e-2, rtol=5e-2), \
        "mismatch vs f32 reference"

    print("KERNEL_OK")
</pallas_src>

<mosaic_0001>
module attributes {stable_mosaic.version = 11 : i64} {
  func.func @_diffusion_embedding_kernel(%arg0: i32, %arg1: memref<8xi32, #tpu.memory_space<smem>>, %arg2: memref<50x128xf32, #tpu.memory_space<vmem>>, %arg3: memref<128x128xbf16, #tpu.memory_space<vmem>>, %arg4: memref<1x128xf32, #tpu.memory_space<vmem>>, %arg5: memref<128x128xbf16, #tpu.memory_space<vmem>>, %arg6: memref<1x128xf32, #tpu.memory_space<vmem>>, %arg7: memref<8x128xf32, #tpu.memory_space<vmem>>) attributes {dimension_semantics = [#tpu.dimension_semantics<arbitrary>], iteration_bounds = array<i64: 1>, scalar_prefetch = 1 : i64, scratch_operands = 0 : i64, tpu.core_type = #tpu.core_type<tc>, window_params = [{pipeline_mode = #tpu.pipeline_mode<synchronous>, transform_indices = @transform_0, window_bounds = array<i64: 50, 128>}, {pipeline_mode = #tpu.pipeline_mode<synchronous>, transform_indices = @transform_1, window_bounds = array<i64: 128, 128>}, {pipeline_mode = #tpu.pipeline_mode<synchronous>, transform_indices = @transform_2, window_bounds = array<i64: 1, 128>}, {pipeline_mode = #tpu.pipeline_mode<synchronous>, transform_indices = @transform_3, window_bounds = array<i64: 128, 128>}, {pipeline_mode = #tpu.pipeline_mode<synchronous>, transform_indices = @transform_4, window_bounds = array<i64: 1, 128>}, {pipeline_mode = #tpu.pipeline_mode<synchronous>, transform_indices = @transform_5, window_bounds = array<i64: 8, 128>}]} {
    %c0 = arith.constant 0 : index
    %0 = memref.load %arg1[%c0] : memref<8xi32, #tpu.memory_space<smem>>
    %1 = arith.index_cast %0 : i32 to index
    %c0_0 = arith.constant 0 : index
    %2 = vector.load %arg2[%1, %c0_0] : memref<50x128xf32, #tpu.memory_space<vmem>>, vector<1x128xf32>
    %c1 = arith.constant 1 : index
    %3 = memref.load %arg1[%c1] : memref<8xi32, #tpu.memory_space<smem>>
    %4 = arith.index_cast %3 : i32 to index
    %c0_1 = arith.constant 0 : index
    %5 = vector.load %arg2[%4, %c0_1] : memref<50x128xf32, #tpu.memory_space<vmem>>, vector<1x128xf32>
    %c2 = arith.constant 2 : index
    %6 = memref.load %arg1[%c2] : memref<8xi32, #tpu.memory_space<smem>>
    %7 = arith.index_cast %6 : i32 to index
    %c0_2 = arith.constant 0 : index
    %8 = vector.load %arg2[%7, %c0_2] : memref<50x128xf32, #tpu.memory_space<vmem>>, vector<1x128xf32>
    %c3 = arith.constant 3 : index
    %9 = memref.load %arg1[%c3] : memref<8xi32, #tpu.memory_space<smem>>
    %10 = arith.index_cast %9 : i32 to index
    %c0_3 = arith.constant 0 : index
    %11 = vector.load %arg2[%10, %c0_3] : memref<50x128xf32, #tpu.memory_space<vmem>>, vector<1x128xf32>
    %c4 = arith.constant 4 : index
    %12 = memref.load %arg1[%c4] : memref<8xi32, #tpu.memory_space<smem>>
    %13 = arith.index_cast %12 : i32 to index
    %c0_4 = arith.constant 0 : index
    %14 = vector.load %arg2[%13, %c0_4] : memref<50x128xf32, #tpu.memory_space<vmem>>, vector<1x128xf32>
    %c5 = arith.constant 5 : index
    %15 = memref.load %arg1[%c5] : memref<8xi32, #tpu.memory_space<smem>>
    %16 = arith.index_cast %15 : i32 to index
    %c0_5 = arith.constant 0 : index
    %17 = vector.load %arg2[%16, %c0_5] : memref<50x128xf32, #tpu.memory_space<vmem>>, vector<1x128xf32>
    %c6 = arith.constant 6 : index
    %18 = memref.load %arg1[%c6] : memref<8xi32, #tpu.memory_space<smem>>
    %19 = arith.index_cast %18 : i32 to index
    %c0_6 = arith.constant 0 : index
    %20 = vector.load %arg2[%19, %c0_6] : memref<50x128xf32, #tpu.memory_space<vmem>>, vector<1x128xf32>
    %c7 = arith.constant 7 : index
    %21 = memref.load %arg1[%c7] : memref<8xi32, #tpu.memory_space<smem>>
    %22 = arith.index_cast %21 : i32 to index
    %c0_7 = arith.constant 0 : index
    %23 = vector.load %arg2[%22, %c0_7] : memref<50x128xf32, #tpu.memory_space<vmem>>, vector<1x128xf32>
    %24 = tpu.concatenate %2, %5, %8, %11, %14, %17, %20, %23 in 0 : vector<1x128xf32>, vector<1x128xf32>, vector<1x128xf32>, vector<1x128xf32>, vector<1x128xf32>, vector<1x128xf32>, vector<1x128xf32>, vector<1x128xf32> -> vector<8x128xf32>
    %25 = arith.truncf %24 : vector<8x128xf32> to vector<8x128xbf16>
    %c0_8 = arith.constant 0 : index
    %c0_9 = arith.constant 0 : index
    %26 = vector.load %arg3[%c0_8, %c0_9] : memref<128x128xbf16, #tpu.memory_space<vmem>>, vector<128x128xbf16>
    %cst = arith.constant dense<0.000000e+00> : vector<8x128xf32>
    %27 = tpu.matmul %25, %26, %cst {dimension_numbers = #tpu.dot_dimension_numbers<[1], [0], [0], [1], [0, 0, 1, 1], [], []>} : vector<8x128xbf16>, vector<128x128xbf16>, vector<8x128xf32> -> vector<8x128xf32>
    %c0_10 = arith.constant 0 : index
    %c0_11 = arith.constant 0 : index
    %28 = vector.load %arg4[%c0_10, %c0_11] : memref<1x128xf32, #tpu.memory_space<vmem>>, vector<1x128xf32>
    %29 = vector.broadcast %28 : vector<1x128xf32> to vector<8x128xf32>
    %30 = arith.addf %27, %29 : vector<8x128xf32>
    %31 = arith.negf %30 : vector<8x128xf32>
    %32 = math.exp %31 : vector<8x128xf32>
    %cst_12 = arith.constant 1.000000e+00 : f32
    %33 = vector.broadcast %cst_12 : f32 to vector<8x128xf32>
    %34 = arith.addf %33, %32 : vector<8x128xf32>
    %35 = arith.divf %33, %34 : vector<8x128xf32>
    %36 = arith.mulf %30, %35 : vector<8x128xf32>
    %37 = arith.truncf %36 : vector<8x128xf32> to vector<8x128xbf16>
    %c0_13 = arith.constant 0 : index
    %c0_14 = arith.constant 0 : index
    %38 = vector.load %arg5[%c0_13, %c0_14] : memref<128x128xbf16, #tpu.memory_space<vmem>>, vector<128x128xbf16>
    %cst_15 = arith.constant dense<0.000000e+00> : vector<8x128xf32>
    %39 = tpu.matmul %37, %38, %cst_15 {dimension_numbers = #tpu.dot_dimension_numbers<[1], [0], [0], [1], [0, 0, 1, 1], [], []>} : vector<8x128xbf16>, vector<128x128xbf16>, vector<8x128xf32> -> vector<8x128xf32>
    %c0_16 = arith.constant 0 : index
    %c0_17 = arith.constant 0 : index
    %40 = vector.load %arg6[%c0_16, %c0_17] : memref<1x128xf32, #tpu.memory_space<vmem>>, vector<1x128xf32>
    %41 = vector.broadcast %40 : vector<1x128xf32> to vector<8x128xf32>
    %42 = arith.addf %39, %41 : vector<8x128xf32>
    %43 = arith.negf %42 : vector<8x128xf32>
    %44 = math.exp %43 : vector<8x128xf32>
    %cst_18 = arith.constant 1.000000e+00 : f32
    %45 = vector.broadcast %cst_18 : f32 to vector<8x128xf32>
    %46 = arith.addf %45, %44 : vector<8x128xf32>
    %47 = arith.divf %45, %46 : vector<8x128xf32>
    %48 = arith.mulf %42, %47 : vector<8x128xf32>
    %c0_19 = arith.constant 0 : index
    %c0_20 = arith.constant 0 : index
    %49 = vector.load %arg7[%c0_19, %c0_20] : memref<8x128xf32, #tpu.memory_space<vmem>>, vector<8x128xf32>
    tpu.vector_store %arg7[%c0_19, %c0_20], %48 {strides = array<i32>} : memref<8x128xf32, #tpu.memory_space<vmem>>, vector<8x128xf32>,
    return
  }
  func.func @transform_0(%arg0: i32, %arg1: memref<8xi32, #tpu.memory_space<smem>>) -> (i32, i32) {
    %c0_i32 = arith.constant 0 : i32
    %c0_i32_0 = arith.constant 0 : i32
    %c0_i32_1 = arith.constant 0 : i32
    return %c0_i32, %c0_i32_0 : i32, i32
  }
  func.func @transform_1(%arg0: i32, %arg1: memref<8xi32, #tpu.memory_space<smem>>) -> (i32, i32) {
    %c0_i32 = arith.constant 0 : i32
    %c0_i32_0 = arith.constant 0 : i32
    %c0_i32_1 = arith.constant 0 : i32
    return %c0_i32, %c0_i32_0 : i32, i32
  }
  func.func @transform_2(%arg0: i32, %arg1: memref<8xi32, #tpu.memory_space<smem>>) -> (i32, i32) {
    %c0_i32 = arith.constant 0 : i32
    %c0_i32_0 = arith.constant 0 : i32
    %c0_i32_1 = arith.constant 0 : i32
    return %c0_i32, %c0_i32_0 : i32, i32
  }
  func.func @transform_3(%arg0: i32, %arg1: memref<8xi32, #tpu.memory_space<smem>>) -> (i32, i32) {
    %c0_i32 = arith.constant 0 : i32
    %c0_i32_0 = arith.constant 0 : i32
    %c0_i32_1 = arith.constant 0 : i32
    return %c0_i32, %c0_i32_0 : i32, i32
  }
  func.func @transform_4(%arg0: i32, %arg1: memref<8xi32, #tpu.memory_space<smem>>) -> (i32, i32) {
    %c0_i32 = arith.constant 0 : i32
    %c0_i32_0 = arith.constant 0 : i32
    %c0_i32_1 = arith.constant 0 : i32
    return %c0_i32, %c0_i32_0 : i32, i32
  }
  func.func @transform_5(%arg0: i32, %arg1: memref<8xi32, #tpu.memory_space<smem>>) -> (i32, i32) {
    %c0_i32 = arith.constant 0 : i32
    %c0_i32_0 = arith.constant 0 : i32
    %c0_i32_1 = arith.constant 0 : i32
    return %c0_i32, %c0_i32_0 : i32, i32
  }
}

</mosaic_0001>

<bundles_post_ra>
// kernel: tpu_custom_call.1
= control target key start
LH: loop header
LB: loop body
LE: loop exit
PB: predicated region body
PF: predicated region fallthrough
CT: control target
= control target key end

     0   :  { %s591_s24 = smov [#allocation3]   ;;  %s656_s0 = inlined_call_operand.hbm [shape: s32[8], index: 0, kind: input, shape index: {}]   ;;  %s657_s1 = inlined_call_operand.hbm [shape: f32[50,128], index: 1, kind: input, shape index: {}]   ;;  %s658_s2 = inlined_call_operand.hbm [shape: bf16[128,128], index: 2, kind: input, shape index: {}]   ;;  %s659_s3 = inlined_call_operand.vmem [shape: f32[1,128], index: 3, kind: input, shape index: {}]   ;;  %s660_s4 = inlined_call_operand.hbm [shape: bf16[128,128], index: 4, kind: input, shape index: {}]   ;;  %s661_s5 = inlined_call_operand.vmem [shape: f32[1,128], index: 5, kind: input, shape index: {}]   ;;  %s662_s6 = inlined_call_operand.hbm [shape: f32[8,128], index: 6, kind: output, shape index: {}]  }
   0x1   :  { %s12_s23 = sshll.u32 %s656_s0, 4  ;;  %s13_s23 = int_to_ptr.hbm [resolvable:$true] %s12_s23 }
   0x2   :  { %15 = dma.hbm_to_smem %s13_s23, 16, %s591_s24, [#allocation2] }
   0x3   :  { %583 = dma.done.wait [#allocation2], 16 }
   0x4   :  { %584 = vsyncadd [#allocation2], 4294967280 }
   0x5   :  { %18 = sfence }
   0x6   :  { %19 = vsyncpa [#allocation5], 0 }
   0x7   :  { %20 = vsyncpa [#allocation8], 0  ;;  %s39_s27 = sshll.u32 %s658_s2, 4  ;;  %s40_s27 = int_to_ptr.hbm [resolvable:$true] %s39_s27 }
   0x8   :  { %21 = vsyncpa [#allocation6], 0  ;;  %s592_s28 = smov [#allocation7]   ;;  %s26_s0 = sshll.u32 %s657_s1, 4  ;;  %s27_s0 = int_to_ptr.hbm [resolvable:$true] %s26_s0 }
   0x9   :  { %s41_s29 = sshll.u32 %s592_s28, 4  ;;  %s593_s8 = smov 64   ;;  %s42_s29 = int_to_ptr.vmem [resolvable:$true] %s41_s29 }
   0xa   :  { %s594_s9 = smov 4   ;;  %s595_s10 = smov [#allocation4]  }
   0xb   :  { %47 = dma.hbm_to_vmem [thread:$0]  %s40_s27, 1024, %s42_s29, [#allocation8], %s593_s8, %s593_s8, %s594_s9  }
   0xc   :  { %s28_s11 = sshll.u32 %s595_s10, 4  ;;  %s596_s12 = smov 128   ;;  %s29_s11 = int_to_ptr.vmem [resolvable:$true] %s28_s11 }
   0xd   :  { %s597_s13 = smov 8   ;;  %s54_s15 = sshll.u32 %s660_s4, 4  ;;  %s55_s15 = int_to_ptr.hbm [resolvable:$true] %s54_s15 }
   0xe   :  { %34 = dma.hbm_to_vmem [thread:$0]  %s27_s0, 896, %s29_s11, [#allocation5], %s596_s12, %s596_s12, %s597_s13  }
   0xf   :  { %s598_s16 = smov [#allocation9]  }
  0x10   :  { %s56_s17 = sshll.u32 %s598_s16, 4  ;;  %s57_s17 = int_to_ptr.vmem [resolvable:$true] %s56_s17 }
  0x11   :  { %62 = dma.hbm_to_vmem [thread:$0]  %s55_s15, 1024, %s57_s17, [#allocation8], %s593_s8, %s593_s8, %s594_s9  }
  0x12   :  { %585 = dma.done.wait [#allocation5], 896  }
  0x13   :  { %586 = vsyncadd [#allocation5], 4294966400 }
  0x14   :  { %587 = dma.done.wait [#allocation8], 2048  }
  0x15   :  { %588 = vsyncadd [#allocation8], 4294965248  ;;  %s77_s1 = sld [smem:[#allocation3]]  ;;  %v447_v0 = vld [vmem:[#allocation7 + $0x38] sm:$0xff]  ;;  %v446_v1 = vld [vmem:[#allocation7 + $0x30] sm:$0xff]  ;;  %vm122_vm0 = vcmask 1040384  }
  0x16   :  { %s367_s18 = sld [smem:[#allocation3 + $0x1]]  ;;  %205 = vmatpush.bf16.msra.mxu0 %v447_v0  ;;  %v445_v6 = vld [vmem:[#allocation7 + $0x28] sm:$0xff]  ;;  %vm124_vm1 = vcmask 1041408   ;;  %v444_v10 = vld [vmem:[#allocation7 + $0x20] sm:$0xff]  ;;  %vm126_vm2 = vcmask 1042432   ;;  %v443_v16 = vld [vmem:[#allocation7 + $0x18] sm:$0xff] }
  0x17   :  { %s368_s19 = sld [smem:[#allocation3 + $0x2]]  ;;  %vm128_vm3 = vcmask 1043456   ;;  %vm130_vm4 = vcmask 1044480   ;;  %v442_v21 = vld [vmem:[#allocation7 + $0x10] sm:$0xff]  ;;  %vm132_vm5 = vcmask 1045504   ;;  %v441_v25 = vld [vmem:[#allocation7 + $0x8] sm:$0xff] }
  0x18   :  { %s369_s20 = sld [smem:[#allocation3 + $0x3]]  ;;  %vm134_vm6 = vcmask 1046528   ;;  %v440_v28 = vld [vmem:[#allocation7] sm:$0xff]  ;;  %v455_v31 = vld [vmem:[#allocation9 + $0x38] sm:$0xff]  ;;  %v454_v32 = vld [vmem:[#allocation9 + $0x30] sm:$0xff]  ;;  %s348_s13 = sshll.u32 %s662_s6, 4  ;;  %s349_s13 = int_to_ptr.hbm [resolvable:$true] %s348_s13 }
  0x19   :  { %s370_s21 = sld [smem:[#allocation3 + $0x4]]  ;;  %307 = vmatpush.bf16.msra.mxu1 %v455_v31  ;;  %v453_v33 = vld [vmem:[#allocation9 + $0x28] sm:$0xff]  ;;  %v452_v34 = vld [vmem:[#allocation9 + $0x20] sm:$0xff]  ;;  %v451_v35 = vld [vmem:[#allocation9 + $0x18] sm:$0xff] }
  0x1a   :  { %s371_s22 = sld [smem:[#allocation3 + $0x5]]  ;;  %206 = vmatpush.bf16.msra.mxu0 %v446_v1  ;;  %v450_v36 = vld [vmem:[#allocation9 + $0x10] sm:$0xff]  ;;  %v449_v37 = vld [vmem:[#allocation9 + $0x8] sm:$0xff]  ;;  %v448_v38 = vld [vmem:[#allocation9] sm:$0xff] }
  0x1b   :  { %s78_s24 = scalar_lea.vmem [#allocation4], %s77_s1  ;;  %s372_s25 = sld [smem:[#allocation3 + $0x6]]  ;;  %v465_v39 = vld [vmem:[%s659_s3] ss:$0 sm:$0xff] }
  0x1c   :  { %s81_s23 = scalar_lea.vmem [#allocation4], %s367_s18  ;;  %v79_v5 = vld [vmem:[%s78_s24] sm:$0x1]  ;;  %s373_s27 = sld [smem:[#allocation3 + $0x7]] }
  0x1d   :  { %v82_v2 = vld [vmem:[%s81_s23] sm:$0x1]  ;;  %s84_s4 = scalar_lea.vmem [#allocation4], %s368_s19  ;;  %308 = vmatpush.bf16.msra.mxu1 %v454_v32 }
  0x1e   :  { %v85_v3 = vld [vmem:[%s84_s4] sm:$0x1]  ;;  %v102_v4 = vrot.slane %v82_v2, 7  ;;  %s87_s26 = scalar_lea.vmem [#allocation4], %s369_s20  ;;  %207 = vmatpush.bf16.msra.mxu0 %v445_v6 }
  0x1f   :  { %v88_v7 = vld [vmem:[%s87_s26] sm:$0x1]  ;;  %v105_v8 = vrot.slane %v85_v3, 6  ;;  %s90_s28 = scalar_lea.vmem [#allocation4], %s370_s21 }
  0x20   :  { %v123_v9 = vsel %vm122_vm0, %v79_v5, %v102_v4  ;;  %v91_v11 = vld [vmem:[%s90_s28] sm:$0x1]  ;;  %v108_v12 = vrot.slane %v88_v7, 5  ;;  %s93_s29 = scalar_lea.vmem [#allocation4], %s371_s22 }
  0x21   :  { %v125_v13 = vsel %vm124_vm1, %v123_v9, %v105_v8  ;;  %v94_v14 = vld [vmem:[%s93_s29] sm:$0x1]  ;;  %v111_v15 = vrot.slane %v91_v11, 4  ;;  %s96_s30 = scalar_lea.vmem [#allocation4], %s372_s25  ;;  %309 = vmatpush.bf16.msra.mxu1 %v453_v33 }
  0x22   :  { %208 = vmatpush.bf16.msra.mxu0 %v444_v10  ;;  %v127_v17 = vsel %vm126_vm2, %v125_v13, %v108_v12  ;;  %v97_v18 = vld [vmem:[%s96_s30] sm:$0x1]  ;;  %v114_v19 = vrot.slane %v94_v14, 3  ;;  %s99_s7 = scalar_lea.vmem [#allocation4], %s373_s27 }
  0x23   :  { %v129_v20 = vsel %vm128_vm3, %v127_v17, %v111_v15  ;;  %v100_v22 = vld [vmem:[%s99_s7] sm:$0x1]  ;;  %v117_v23 = vrot.slane %v97_v18, 2 }
  0x24   :  { %v131_v24 = vsel %vm130_vm4, %v129_v20, %v114_v19  ;;  %v120_v26 = vrot.slane %v100_v22, 1  ;;  %v466_v58 = vld [vmem:[%s661_s5] ss:$0 sm:$0xff]  ;;  %s599_s5 = smov [#allocation10]  }
  0x25   :  { %v133_v27 = vsel %vm132_vm5, %v131_v24, %v117_v23  ;;  %310 = vmatpush.bf16.msra.mxu1 %v452_v34  ;;  %s346_s10 = sshll.u32 %s599_s5, 4  ;;  %s347_s10 = int_to_ptr.vmem [resolvable:$true] %s346_s10 }
  0x26   :  { %209 = vmatpush.bf16.msra.mxu0 %v443_v16  ;;  %v135_v29 = vsel %vm134_vm6, %v133_v27, %v120_v26 }
  0x27   :  { %v136_v30 = vpack.c.bf16 %v135_v29, %v135_v29 }
  0x29   :  { %311 = vmatpush.bf16.msra.mxu1 %v451_v35 }
  0x2a   :  { %210 = vmatpush.bf16.msra.mxu0 %v442_v21 }
  0x2d   :  { %312 = vmatpush.bf16.msra.mxu1 %v450_v36 }
  0x2e   :  { %211 = vmatpush.bf16.msra.mxu0 %v441_v25 }
  0x31   :  { %313 = vmatpush.bf16.msra.mxu1 %v449_v37 }
  0x32   :  { %212 = vmatpush.bf16.msra.mxu0 %v440_v28 }
  0x35   :  { %213 = vmatmul.bf16.vlgmr.msra.gmra.mxu0 %v136_v30  ;;  %314 = vmatpush.bf16.msra.mxu1 %v448_v38 }
  0xb2   :  { %v214_v40 = vpop.f32.mrf.mxu0 }
  0xb3   :  { %v215_v41 = vadd.f32 %v465_v39, %v214_v40 }
  0xb5   :  { %v406_v42 = vmul.f32 -1.442695, %v215_v41 }
  0xb7   :  { %467 = vpow2.f32 %v406_v42 }
  0xba   :  { %v216_v43 = vpop.f32.mrf.mxu0 }
  0xbd   :  { %v468_v44 = vpop.eup %467 }
  0xbe   :  { %v221_v45 = vadd.f32 1.0, %v468_v44 }
  0xc0   :  { %469 = vrcp.f32 %v221_v45  ;;  %v233_v49 = vand.u32 2147483648, %v221_v45  ;;  %v231_v51 = vand.u32 2147483647, %v221_v45  ;;  %vm227_vm8 = vweird.f32 %v221_v45 }
  0xc2   :  { %v234_v53 = vor.u32 1.1754944e-38, %v233_v49  ;;  %vm232_vm10 = vcmp.eq.f32.partialorder %v231_v51, 8.507059e+37 }
  0xc6   :  { %v470_v46 = vpop.eup %469 }
  0xc7   :  { %v223_v47 = vmul.f32 %v470_v46, %v221_v45  ;;  %vm228_vm7 = vweird.f32 %v470_v46 }
  0xc8   :  { %vm229_vm9 = vmor %vm227_vm8, %vm228_vm7 }
  0xc9   :  { %v224_v48 = vsub.f32 1.0, %v223_v47 }
  0xcb   :  { %v225_v50 = vmul.f32 %v470_v46, %v224_v48 }
  0xcd   :  { %v226_v52 = vadd.f32 %v470_v46, %v225_v50 }
  0xcf   :  { %v230_v54 = vsel %vm229_vm9, %v470_v46, %v226_v52 }
  0xd0   :  { %v235_v55 = vsel %vm232_vm10, %v234_v53, %v230_v54 }
  0xd1   :  { %v237_v56 = vmul.f32 %v235_v55, %v215_v41 }
  0xd3   :  { %v238_v57 = vpack.c.bf16 %v237_v56, %v237_v56 }
  0xd5   :  { %315 = vmatmul.bf16.vlgmr.msra.gmra.mxu1 %v238_v57 }
 0x152   :  { %v316_v59 = vpop.f32.mrf.mxu1 }
 0x153   :  { %v317_v60 = vadd.f32 %v466_v58, %v316_v59 }
 0x155   :  { %v439_v61 = vmul.f32 -1.442695, %v317_v60 }
 0x157   :  { %471 = vpow2.f32 %v439_v61 }
 0x15a   :  { %v318_v62 = vpop.f32.mrf.mxu1 }
 0x15d   :  { %v472_v63 = vpop.eup %471 }
 0x15e   :  { %v323_v0 = vadd.f32 1.0, %v472_v63 }
 0x160   :  { %473 = vrcp.f32 %v323_v0  ;;  %v335_v4 = vand.u32 2147483648, %v323_v0  ;;  %v333_v6 = vand.u32 2147483647, %v323_v0  ;;  %vm329_vm12 = vweird.f32 %v323_v0 }
 0x162   :  { %v336_v8 = vor.u32 1.1754944e-38, %v335_v4  ;;  %vm334_vm14 = vcmp.eq.f32.partialorder %v333_v6, 8.507059e+37 }
 0x166   :  { %v474_v1 = vpop.eup %473 }
 0x167   :  { %v325_v2 = vmul.f32 %v474_v1, %v323_v0  ;;  %vm330_vm11 = vweird.f32 %v474_v1 }
 0x168   :  { %vm331_vm13 = vmor %vm329_vm12, %vm330_vm11 }
 0x169   :  { %v326_v3 = vsub.f32 1.0, %v325_v2 }
 0x16b   :  { %v327_v5 = vmul.f32 %v474_v1, %v326_v3 }
 0x16d   :  { %v328_v7 = vadd.f32 %v474_v1, %v327_v5 }
 0x16f   :  { %v332_v9 = vsel %vm331_vm13, %v474_v1, %v328_v7 }
 0x170   :  { %v337_v10 = vsel %vm334_vm14, %v336_v8, %v332_v9 }
 0x171   :  { %v339_v11 = vmul.f32 %v337_v10, %v317_v60 }
 0x173   :  { %340 = vst [vmem:[#allocation10] sm:$0xff] %v339_v11 }
 0x174   :  { %351 = dma.vmem_to_hbm [thread:$0]  %s347_s10, 128, %s349_s13, [#allocation6]  }
 0x175   :  { %589 = dma.done.wait [#allocation6], 128  }
 0x176   :  { %590 = vsyncadd [#allocation6], 4294967168 }
 0x177   :  { %356 = vsyncpa [#allocation5], 1 }
 0x178   :  { %357 = vsyncpa [#allocation8], 1 }
 0x179   :  { %358 = vsyncpa [#allocation6], 1 }

</bundles_post_ra>
